<compile_context>
chip_gen: v7x
topology: tpu7x:2x2x1
jax: 0.10.0
libtpu: 0.0.40
codegen_flags: <defaults>
</compile_context>

<pallas_src>
import jax
import jax.numpy as jnp
from jax import lax
from jax.experimental import pallas as pl
from jax.experimental.pallas import tpu as pltpu


def _round_up(a, b):
    return (a + b - 1) // b * b


# ----------------------------------------------------------------------------
# Kernels
# ----------------------------------------------------------------------------
def _ffn_kernel_fused_out(x_ref, w1_ref, b1_ref, w2_ref, b2_ref, o_ref):
    """f32 output: accumulate directly into o_ref (no scratch), bias folded at init."""
    k = pl.program_id(1)

    @pl.when(k == 0)
    def _():
        # Fold the fc_2 bias into the accumulator initialization.
        o_ref[...] = jnp.zeros_like(o_ref) + b2_ref[...]

    x = x_ref[...]
    # fc_1 chunk:  h = relu(x @ W1_chunk^T + b1_chunk)   -> (tm, pf_tile)
    h = lax.dot_general(
        x, w1_ref[...],
        dimension_numbers=(((1,), (1,)), ((), ())),
        preferred_element_type=jnp.float32,
    )
    h = jnp.maximum(h + b1_ref[...], 0.0)          # ReLU (dropout = identity, eval)

    # fc_2 partial sum:  o += h @ W2_chunk^T        -> (tm, hid)
    o_ref[...] += lax.dot_general(
        h.astype(w2_ref.dtype), w2_ref[...],
        dimension_numbers=(((1,), (1,)), ((), ())),
        preferred_element_type=jnp.float32,
    )


def _ffn_kernel_scratch(x_ref, w1_ref, b1_ref, w2_ref, b2_ref, o_ref, acc_ref):
    """Non-f32 output: f32 VMEM accumulator, cast on the final k step."""
    k = pl.program_id(1)

    @pl.when(k == 0)
    def _():
        acc_ref[...] = jnp.zeros_like(acc_ref) + b2_ref[...]

    x = x_ref[...]
    h = lax.dot_general(
        x, w1_ref[...],
        dimension_numbers=(((1,), (1,)), ((), ())),
        preferred_element_type=jnp.float32,
    )
    h = jnp.maximum(h + b1_ref[...], 0.0)

    acc_ref[...] += lax.dot_general(
        h.astype(w2_ref.dtype), w2_ref[...],
        dimension_numbers=(((1,), (1,)), ((), ())),
        preferred_element_type=jnp.float32,
    )

    @pl.when(k == pl.num_programs(1) - 1)
    def _():
        o_ref[...] = acc_ref[...].astype(o_ref.dtype)


# ----------------------------------------------------------------------------
# VMEM-aware tile selection
# ----------------------------------------------------------------------------
def _vmem_capacity_bytes():
    try:
        info = pltpu.get_tpu_info()
        cap = getattr(info, "vmem_capacity_bytes", None)
        if cap:
            return int(cap)
    except Exception:
        pass
    return 64 * 1024 * 1024  # conservative default (v7x per-TC VMEM)


def _select_tiles(M, hidp, pfp, in_itm, w_itm, out_itm, need_acc, budget,
                  tm_req=None, pf_tile_req=None):
    def footprint(tm, pft):
        fp = 2 * tm * hidp * in_itm              # x tile (double-buffered)
        fp += 2 * tm * hidp * out_itm            # out tile (double-buffered)
        fp += 2 * pft * hidp * w_itm             # W1 tile (double-buffered)
        fp += 2 * hidp * pft * w_itm             # W2 tile (double-buffered)
        fp += 2 * (pft + hidp) * 4               # biases (f32)
        if need_acc:
            fp += tm * hidp * 4                  # f32 accumulator scratch
        fp += tm * pft * 4                       # fc_1 intermediate h (f32)
        if w_itm != 4:
            fp += tm * pft * w_itm               # low-precision copy of h for fc_2
        return fp

    if tm_req is not None and pf_tile_req is not None:
        return tm_req, pf_tile_req, footprint(tm_req, pf_tile_req)

    tm_cap = max(_round_up(M, 8), 8)
    tm_cands = [t for t in (1024, 512, 256, 128, 64, 32, 16, 8) if t <= tm_cap]
    if tm_req is not None:
        tm_cands = [tm_req]
    pf_cands = [pfp] + [c for c in (8192, 4096, 2048, 1024, 512, 256, 128)
                        if c < pfp and pfp % c == 0]
    if pf_tile_req is not None:
        pf_cands = [pf_tile_req]

    # Prefer fully resident weights (pf_tile == pfp -> weights DMA'd exactly
    # once for the whole grid), then the largest row tile that fits the budget.
    for pft in pf_cands:
        for tm in tm_cands:
            fp = footprint(tm, pft)
            if fp <= budget:
                return tm, pft, fp
    tm, pft = tm_cands[-1], pf_cands[-1]
    return tm, pft, footprint(tm, pft)


# ----------------------------------------------------------------------------
# Wrapper
# ----------------------------------------------------------------------------
def positionwise_feedforward(x, w1, b1, w2, b2, *, tm=None, pf_tile=None,
                             compute_dtype=jnp.bfloat16, out_dtype=None):
    """x: [batch, seq, hid].  w1: [pf, hid], b1: [pf], w2: [hid, pf], b2: [hid]
    (PyTorch nn.Linear weight layout).  Returns [batch, seq, hid] in out_dtype
    (default x.dtype).

    compute_dtype: MXU-input dtype.  Default bf16 (v5e/v6e/v7x MXU-native);
    accumulation is always f32.  In production store W1/W2 in compute_dtype so
    the wrapper-side casts below are no-ops (avoids an extra HBM pass).
    """
    batch, seq, hid = x.shape
    pf = w1.shape[0]
    M = batch * seq
    out_dtype = jnp.dtype(x.dtype if out_dtype is None else out_dtype)
    in_dtype = jnp.dtype(x.dtype if compute_dtype is None else compute_dtype)

    # ---- lane-dense padding targets ----------------------------------------
    hidp = _round_up(hid, 128)
    pfp = _round_up(pf, 128)

    in_itm = jnp.dtype(in_dtype).itemsize
    w_itm = in_itm
    out_itm = jnp.dtype(out_dtype).itemsize
    need_acc = out_dtype != jnp.dtype(jnp.float32)

    # ---- VMEM budget (generation-aware, with headroom) ----------------------
    vmem_cap = _vmem_capacity_bytes()
    budget = min(vmem_cap * 3 // 4, 100 * 1024 * 1024)   # ~48 MiB v7x, ~96 MiB v5e/v6e

    tm, pf_tile, fp = _select_tiles(M, hidp, pfp, in_itm, w_itm, out_itm,
                                    need_acc, budget, tm_req=tm, pf_tile_req=pf_tile)
    if pfp % pf_tile != 0:           # only possible with a user-supplied pf_tile
        pfp = _round_up(pfp, pf_tile)
    Mp = _round_up(M, tm)
    nk = pfp // pf_tile
    n_row = Mp // tm

    # ---- dtype / padding plumbing (outside the hot kernel) ------------------
    # Zero-padding is exact: padded hid columns contribute 0 through fc_1,
    # padded pf rows give relu(0+0)=0 through zero W2 columns, and padded
    # output columns are sliced off.
    x2d = x.reshape(M, hid).astype(in_dtype)
    w1c = w1.astype(in_dtype)      # no-op if weights are already stored in in_dtype
    w2c = w2.astype(in_dtype)
    if Mp != M or hidp != hid:
        x2d = jnp.pad(x2d, ((0, Mp - M), (0, hidp - hid)))
    if pfp != pf or hidp != hid:
        w1c = jnp.pad(w1c, ((0, pfp - pf), (0, hidp - hid)))
        w2c = jnp.pad(w2c, ((0, hidp - hid), (0, pfp - pf)))
    b1p = b1.astype(jnp.float32)
    b2p = b2.astype(jnp.float32)
    if pfp != pf:
        b1p = jnp.pad(b1p, ((0, pfp - pf),))
    if hidp != hid:
        b2p = jnp.pad(b2p, ((0, hidp - hid),))
    b1_2d = b1p.reshape(1, pfp)
    b2_2d = b2p.reshape(1, hidp)

    # ---- index maps (serpentine k order when pf is tiled) --------------------
    # On odd row tiles the k-chunk order is reversed, so the weight chunk at a
    # row-tile boundary is reused instead of re-DMA'd.  Reduction order is
    # irrelevant for the sum, and k==0 / k==last gating stays valid.
    def _serp(i, k):
        return (1 - i % 2) * k + (i % 2) * (nk - 1 - k)

    x_map = lambda i, k: (i, 0)
    w1_map = lambda i, k: (_serp(i, k), 0)
    b1_map = lambda i, k: (0, _serp(i, k))
    w2_map = lambda i, k: (0, _serp(i, k))
    b2_map = lambda i, k: (0, 0)
    o_map = lambda i, k: (i, 0)

    # ---- VMEM limit ----------------------------------------------------------
    vmem_limit = max(int(fp * 1.25) + (2 << 20), 32 * 1024 * 1024)
    vmem_limit = min(vmem_limit, budget)
    vmem_limit = max(vmem_limit, int(fp) + (2 << 20))        # never starve the kernel
    vmem_limit = min(vmem_limit, int(vmem_cap) - (4 << 20))  # physical headroom (v7x)

    # ---- cost estimate (reflects actual weight streaming) --------------------
    weight_chunk_bytes = 2 * pf_tile * hidp * w_itm + pf_tile * 4
    n_weight_fetch = (n_row * nk - (n_row - 1)) if nk > 1 else 1
    cost = pl.CostEstimate(
        flops=4 * Mp * hidp * pfp,
        transcendentals=0,
        bytes_accessed=int(Mp * hidp * in_itm + Mp * hidp * out_itm
                           + n_weight_fetch * weight_chunk_bytes + hidp * 4),
    )

    kernel = _ffn_kernel_scratch if need_acc else _ffn_kernel_fused_out
    scratch = [pltpu.VMEM((tm, hidp), jnp.float32)] if need_acc else []

    out2d = pl.pallas_call(
        kernel,
        out_shape=jax.ShapeDtypeStruct((Mp, hidp), out_dtype),
        grid_spec=pltpu.PrefetchScalarGridSpec(
            num_scalar_prefetch=0,
            grid=(n_row, nk),
            in_specs=[
                pl.BlockSpec((tm, hidp),      x_map),   # x rows
                pl.BlockSpec((pf_tile, hidp), w1_map),  # W1 chunk (PyTorch layout)
                pl.BlockSpec((1, pf_tile),    b1_map),  # b1 chunk
                pl.BlockSpec((hidp, pf_tile), w2_map),  # W2 chunk (PyTorch layout)
                pl.BlockSpec((1, hidp),       b2_map),  # b2
            ],
            out_specs=pl.BlockSpec((tm, hidp), o_map),
            scratch_shapes=scratch,
        ),
        compiler_params=pltpu.CompilerParams(
            dimension_semantics=("parallel", "arbitrary"),
            vmem_limit_bytes=int(vmem_limit),
        ),
        cost_estimate=cost,
    )(x2d, w1c, b1_2d, w2c, b2_2d)

    return out2d[:M, :hid].reshape(batch, seq, hid)


# ----------------------------------------------------------------------------
# Reference + demo
# ----------------------------------------------------------------------------
def _ref_ffn(x, w1, b1, w2, b2):
    h = jnp.maximum(jnp.einsum("bsh,ph->bsp", x, w1) + b1, 0.0)
    return jnp.einsum("bsp,hp->bsh", h, w2) + b2


if __name__ == "__main__":
    batch, seq, hid_dim, pf_dim = 2, 8, 32, 64

    key = jax.random.PRNGKey(0)
    kx, k1, k2, k3, k4 = jax.random.split(key, 5)

    x = jax.random.normal(kx, (batch, seq, hid_dim), dtype=jnp.float32)
    # Deterministic "Linear" parameters (PyTorch layout: weight [out, in]).
    w1 = jax.random.normal(k1, (pf_dim, hid_dim), dtype=jnp.float32) * 0.1
    b1 = jax.random.normal(k2, (pf_dim,), dtype=jnp.float32) * 0.1
    w2 = jax.random.normal(k3, (hid_dim, pf_dim), dtype=jnp.float32) * 0.1
    b2 = jax.random.normal(k4, (hid_dim,), dtype=jnp.float32) * 0.1

    ref = _ref_ffn(x, w1, b1, w2, b2)

    # 1) f32 MXU path: exact match vs reference.
    out_f32 = jax.block_until_ready(
        positionwise_feedforward(x, w1, b1, w2, b2, compute_dtype=jnp.float32))
    assert out_f32.shape == (batch, seq, hid_dim)
    assert jnp.allclose(out_f32, ref, atol=1e-4, rtol=1e-4), "f32 path mismatch"

    # 2) Production default: bf16 MXU inputs, f32 accumulation, f32 output.
    out_bf = jax.block_until_ready(positionwise_feedforward(x, w1, b1, w2, b2))
    assert out_bf.shape == (batch, seq, hid_dim)
    assert jnp.allclose(out_bf, ref, atol=5e-2, rtol=5e-2), "bf16-compute path mismatch"

    # 3) Low-precision activations end-to-end (exercises the scratch-accumulator path).
    out_lp = jax.block_until_ready(
        positionwise_feedforward(x.astype(jnp.bfloat16), w1, b1, w2, b2))
    assert out_lp.dtype == jnp.bfloat16
    assert jnp.allclose(out_lp.astype(jnp.float32), ref, atol=1e-1, rtol=1e-1), \
        "bf16-output path mismatch"

    # 4) Tiled pf reduction (nk=2) + multiple row tiles -> serpentine k order.
    k5, k6 = jax.random.split(k4, 2)
    w1b = jax.random.normal(k5, (256, hid_dim), dtype=jnp.float32) * 0.1
    w2b = jax.random.normal(k6, (hid_dim, 256), dtype=jnp.float32) * 0.1
    b1b = jnp.zeros((256,), jnp.float32)
    b2b = jnp.zeros((hid_dim,), jnp.float32)
    refb = _ref_ffn(x, w1b, b1b, w2b, b2b)
    outb = jax.block_until_ready(
        positionwise_feedforward(x, w1b, b1b, w2b, b2b,
                                 compute_dtype=jnp.float32, tm=8, pf_tile=128))
    assert jnp.allclose(outb, refb, atol=1e-4, rtol=1e-4), "tiled-pf path mismatch"

    print("KERNEL_OK")
</pallas_src>

<mosaic_0001>
module attributes {stable_mosaic.version = 11 : i64} {
  func.func @_ffn_kernel_fused_out(%arg0: i32, %arg1: i32, %arg2: memref<16x128xf32, #tpu.memory_space<vmem>>, %arg3: memref<128x128xf32, #tpu.memory_space<vmem>>, %arg4: memref<1x128xf32, #tpu.memory_space<vmem>>, %arg5: memref<128x128xf32, #tpu.memory_space<vmem>>, %arg6: memref<1x128xf32, #tpu.memory_space<vmem>>, %arg7: memref<16x128xf32, #tpu.memory_space<vmem>>) attributes {dimension_semantics = [#tpu.dimension_semantics<parallel>, #tpu.dimension_semantics<arbitrary>], iteration_bounds = array<i64: 1, 1>, scalar_prefetch = 0 : i64, scratch_operands = 0 : i64, tpu.core_type = #tpu.core_type<tc>, window_params = [{transform_indices = @transform_0, window_bounds = array<i64: 16, 128>}, {transform_indices = @transform_1, window_bounds = array<i64: 128, 128>}, {transform_indices = @transform_2, window_bounds = array<i64: 1, 128>}, {transform_indices = @transform_3, window_bounds = array<i64: 128, 128>}, {pipeline_mode = #tpu.pipeline_mode<synchronous>, transform_indices = @transform_4, window_bounds = array<i64: 1, 128>}, {transform_indices = @transform_5, window_bounds = array<i64: 16, 128>}]} {
    %c0_i32 = arith.constant 0 : i32
    %0 = arith.cmpi eq, %arg1, %c0_i32 : i32
    %1 = arith.extui %0 : i1 to i32
    %c0_i32_0 = arith.constant 0 : i32
    %2 = arith.cmpi ne, %1, %c0_i32_0 : i32
    scf.if %2 {
      %cst_14 = arith.constant 0.000000e+00 : f32
      %16 = vector.broadcast %cst_14 : f32 to vector<16x128xf32>
      %c0_15 = arith.constant 0 : index
      %c0_16 = arith.constant 0 : index
      %17 = vector.load %arg6[%c0_15, %c0_16] : memref<1x128xf32, #tpu.memory_space<vmem>>, vector<1x128xf32>
      %18 = vector.broadcast %17 : vector<1x128xf32> to vector<16x128xf32>
      %19 = arith.addf %16, %18 : vector<16x128xf32>
      %c0_17 = arith.constant 0 : index
      %c0_18 = arith.constant 0 : index
      %20 = vector.load %arg7[%c0_17, %c0_18] : memref<16x128xf32, #tpu.memory_space<vmem>>, vector<16x128xf32>
      tpu.vector_store %arg7[%c0_17, %c0_18], %19 {strides = array<i32>} : memref<16x128xf32, #tpu.memory_space<vmem>>, vector<16x128xf32>,
    } else {
    }
    %c0 = arith.constant 0 : index
    %c0_1 = arith.constant 0 : index
    %3 = vector.load %arg2[%c0, %c0_1] : memref<16x128xf32, #tpu.memory_space<vmem>>, vector<16x128xf32>
    %c0_2 = arith.constant 0 : index
    %c0_3 = arith.constant 0 : index
    %4 = vector.load %arg3[%c0_2, %c0_3] : memref<128x128xf32, #tpu.memory_space<vmem>>, vector<128x128xf32>
    %cst = arith.constant dense<0.000000e+00> : vector<16x128xf32>
    %5 = tpu.matmul %3, %4, %cst {dimension_numbers = #tpu.dot_dimension_numbers<[1], [1], [0], [0], [0, 0, 1, 0], [], []>} : vector<16x128xf32>, vector<128x128xf32>, vector<16x128xf32> -> vector<16x128xf32>
    %c0_4 = arith.constant 0 : index
    %c0_5 = arith.constant 0 : index
    %6 = vector.load %arg4[%c0_4, %c0_5] : memref<1x128xf32, #tpu.memory_space<vmem>>, vector<1x128xf32>
    %7 = vector.broadcast %6 : vector<1x128xf32> to vector<16x128xf32>
    %8 = arith.addf %5, %7 : vector<16x128xf32>
    %cst_6 = arith.constant 0.000000e+00 : f32
    %9 = vector.broadcast %cst_6 : f32 to vector<16x128xf32>
    %10 = arith.maximumf %8, %9 : vector<16x128xf32>
    %c0_7 = arith.constant 0 : index
    %c0_8 = arith.constant 0 : index
    %11 = vector.load %arg7[%c0_7, %c0_8] : memref<16x128xf32, #tpu.memory_space<vmem>>, vector<16x128xf32>
    %c0_9 = arith.constant 0 : index
    %c0_10 = arith.constant 0 : index
    %12 = vector.load %arg5[%c0_9, %c0_10] : memref<128x128xf32, #tpu.memory_space<vmem>>, vector<128x128xf32>
    %cst_11 = arith.constant dense<0.000000e+00> : vector<16x128xf32>
    %13 = tpu.matmul %10, %12, %cst_11 {dimension_numbers = #tpu.dot_dimension_numbers<[1], [1], [0], [0], [0, 0, 1, 0], [], []>} : vector<16x128xf32>, vector<128x128xf32>, vector<16x128xf32> -> vector<16x128xf32>
    %14 = arith.addf %11, %13 : vector<16x128xf32>
    %c0_12 = arith.constant 0 : index
    %c0_13 = arith.constant 0 : index
    %15 = vector.load %arg7[%c0_12, %c0_13] : memref<16x128xf32, #tpu.memory_space<vmem>>, vector<16x128xf32>
    tpu.vector_store %arg7[%c0_12, %c0_13], %14 {strides = array<i32>} : memref<16x128xf32, #tpu.memory_space<vmem>>, vector<16x128xf32>,
    return
  }
  func.func @transform_0(%arg0: i32, %arg1: i32) -> (i32, i32) {
    %c0_i32 = arith.constant 0 : i32
    %c0_i32_0 = arith.constant 0 : i32
    return %arg0, %c0_i32 : i32, i32
  }
  func.func @transform_1(%arg0: i32, %arg1: i32) -> (i32, i32) {
    %c2_i32 = arith.constant 2 : i32
    %c0_i32 = arith.constant 0 : i32
    %0 = arith.cmpi eq, %c2_i32, %c0_i32 : i32
    %c1_i32 = arith.constant 1 : i32
    %1 = arith.select %0, %c1_i32, %c2_i32 : i32
    %2 = arith.remsi %arg0, %1 : i32
    %c0_i32_0 = arith.constant 0 : i32
    %3 = arith.cmpi ne, %2, %c0_i32_0 : i32
    %c0_i32_1 = arith.constant 0 : i32
    %4 = arith.cmpi slt, %2, %c0_i32_1 : i32
    %c0_i32_2 = arith.constant 0 : i32
    %5 = arith.cmpi slt, %1, %c0_i32_2 : i32
    %6 = arith.xori %4, %5 : i1
    %7 = arith.andi %6, %3 : i1
    %8 = arith.addi %2, %1 : i32
    %9 = arith.select %7, %8, %2 : i32
    %c1_i32_3 = arith.constant 1 : i32
    %10 = arith.subi %c1_i32_3, %9 : i32
    %11 = arith.muli %10, %arg1 : i32
    %c2_i32_4 = arith.constant 2 : i32
    %c0_i32_5 = arith.constant 0 : i32
    %12 = arith.cmpi eq, %c2_i32_4, %c0_i32_5 : i32
    %c1_i32_6 = arith.constant 1 : i32
    %13 = arith.select %12, %c1_i32_6, %c2_i32_4 : i32
    %14 = arith.remsi %arg0, %13 : i32
    %c0_i32_7 = arith.constant 0 : i32
    %15 = arith.cmpi ne, %14, %c0_i32_7 : i32
    %c0_i32_8 = arith.constant 0 : i32
    %16 = arith.cmpi slt, %14, %c0_i32_8 : i32
    %c0_i32_9 = arith.constant 0 : i32
    %17 = arith.cmpi slt, %13, %c0_i32_9 : i32
    %18 = arith.xori %16, %17 : i1
    %19 = arith.andi %18, %15 : i1
    %20 = arith.addi %14, %13 : i32
    %21 = arith.select %19, %20, %14 : i32
    %c0_i32_10 = arith.constant 0 : i32
    %22 = arith.subi %c0_i32_10, %arg1 : i32
    %23 = arith.muli %21, %22 : i32
    %24 = arith.addi %11, %23 : i32
    %c0_i32_11 = arith.constant 0 : i32
    %c0_i32_12 = arith.constant 0 : i32
    return %24, %c0_i32_11 : i32, i32
  }
  func.func @transform_2(%arg0: i32, %arg1: i32) -> (i32, i32) {
    %c2_i32 = arith.constant 2 : i32
    %c0_i32 = arith.constant 0 : i32
    %0 = arith.cmpi eq, %c2_i32, %c0_i32 : i32
    %c1_i32 = arith.constant 1 : i32
    %1 = arith.select %0, %c1_i32, %c2_i32 : i32
    %2 = arith.remsi %arg0, %1 : i32
    %c0_i32_0 = arith.constant 0 : i32
    %3 = arith.cmpi ne, %2, %c0_i32_0 : i32
    %c0_i32_1 = arith.constant 0 : i32
    %4 = arith.cmpi slt, %2, %c0_i32_1 : i32
    %c0_i32_2 = arith.constant 0 : i32
    %5 = arith.cmpi slt, %1, %c0_i32_2 : i32
    %6 = arith.xori %4, %5 : i1
    %7 = arith.andi %6, %3 : i1
    %8 = arith.addi %2, %1 : i32
    %9 = arith.select %7, %8, %2 : i32
    %c1_i32_3 = arith.constant 1 : i32
    %10 = arith.subi %c1_i32_3, %9 : i32
    %11 = arith.muli %10, %arg1 : i32
    %c2_i32_4 = arith.constant 2 : i32
    %c0_i32_5 = arith.constant 0 : i32
    %12 = arith.cmpi eq, %c2_i32_4, %c0_i32_5 : i32
    %c1_i32_6 = arith.constant 1 : i32
    %13 = arith.select %12, %c1_i32_6, %c2_i32_4 : i32
    %14 = arith.remsi %arg0, %13 : i32
    %c0_i32_7 = arith.constant 0 : i32
    %15 = arith.cmpi ne, %14, %c0_i32_7 : i32
    %c0_i32_8 = arith.constant 0 : i32
    %16 = arith.cmpi slt, %14, %c0_i32_8 : i32
    %c0_i32_9 = arith.constant 0 : i32
    %17 = arith.cmpi slt, %13, %c0_i32_9 : i32
    %18 = arith.xori %16, %17 : i1
    %19 = arith.andi %18, %15 : i1
    %20 = arith.addi %14, %13 : i32
    %21 = arith.select %19, %20, %14 : i32
    %c0_i32_10 = arith.constant 0 : i32
    %22 = arith.subi %c0_i32_10, %arg1 : i32
    %23 = arith.muli %21, %22 : i32
    %24 = arith.addi %11, %23 : i32
    %c0_i32_11 = arith.constant 0 : i32
    %c0_i32_12 = arith.constant 0 : i32
    return %c0_i32_11, %24 : i32, i32
  }
  func.func @transform_3(%arg0: i32, %arg1: i32) -> (i32, i32) {
    %c2_i32 = arith.constant 2 : i32
    %c0_i32 = arith.constant 0 : i32
    %0 = arith.cmpi eq, %c2_i32, %c0_i32 : i32
    %c1_i32 = arith.constant 1 : i32
    %1 = arith.select %0, %c1_i32, %c2_i32 : i32
    %2 = arith.remsi %arg0, %1 : i32
    %c0_i32_0 = arith.constant 0 : i32
    %3 = arith.cmpi ne, %2, %c0_i32_0 : i32
    %c0_i32_1 = arith.constant 0 : i32
    %4 = arith.cmpi slt, %2, %c0_i32_1 : i32
    %c0_i32_2 = arith.constant 0 : i32
    %5 = arith.cmpi slt, %1, %c0_i32_2 : i32
    %6 = arith.xori %4, %5 : i1
    %7 = arith.andi %6, %3 : i1
    %8 = arith.addi %2, %1 : i32
    %9 = arith.select %7, %8, %2 : i32
    %c1_i32_3 = arith.constant 1 : i32
    %10 = arith.subi %c1_i32_3, %9 : i32
    %11 = arith.muli %10, %arg1 : i32
    %c2_i32_4 = arith.constant 2 : i32
    %c0_i32_5 = arith.constant 0 : i32
    %12 = arith.cmpi eq, %c2_i32_4, %c0_i32_5 : i32
    %c1_i32_6 = arith.constant 1 : i32
    %13 = arith.select %12, %c1_i32_6, %c2_i32_4 : i32
    %14 = arith.remsi %arg0, %13 : i32
    %c0_i32_7 = arith.constant 0 : i32
    %15 = arith.cmpi ne, %14, %c0_i32_7 : i32
    %c0_i32_8 = arith.constant 0 : i32
    %16 = arith.cmpi slt, %14, %c0_i32_8 : i32
    %c0_i32_9 = arith.constant 0 : i32
    %17 = arith.cmpi slt, %13, %c0_i32_9 : i32
    %18 = arith.xori %16, %17 : i1
    %19 = arith.andi %18, %15 : i1
    %20 = arith.addi %14, %13 : i32
    %21 = arith.select %19, %20, %14 : i32
    %c0_i32_10 = arith.constant 0 : i32
    %22 = arith.subi %c0_i32_10, %arg1 : i32
    %23 = arith.muli %21, %22 : i32
    %24 = arith.addi %11, %23 : i32
    %c0_i32_11 = arith.constant 0 : i32
    %c0_i32_12 = arith.constant 0 : i32
    return %c0_i32_11, %24 : i32, i32
  }
  func.func @transform_4(%arg0: i32, %arg1: i32) -> (i32, i32) {
    %c0_i32 = arith.constant 0 : i32
    %c0_i32_0 = arith.constant 0 : i32
    %c0_i32_1 = arith.constant 0 : i32
    return %c0_i32, %c0_i32_0 : i32, i32
  }
  func.func @transform_5(%arg0: i32, %arg1: i32) -> (i32, i32) {
    %c0_i32 = arith.constant 0 : i32
    %c0_i32_0 = arith.constant 0 : i32
    return %arg0, %c0_i32 : i32, i32
  }
}

</mosaic_0001>

<bundles_post_ra>
// kernel: tpu_custom_call.1
= control target key start
LH: loop header
LB: loop body
LE: loop exit
PB: predicated region body
PF: predicated region fallthrough
CT: control target
= control target key end

     0   :  { %10 = vsyncpa [#allocation3], 0  ;;  %s817_s0 = inlined_call_operand.hbm [shape: f32[16,128], index: 0, kind: input, shape index: {}]   ;;  %s818_s1 = inlined_call_operand.hbm [shape: f32[128,128], index: 1, kind: input, shape index: {}]   ;;  %s819_s2 = inlined_call_operand.vmem [shape: f32[1,128], index: 2, kind: input, shape index: {}]   ;;  %s820_s3 = inlined_call_operand.hbm [shape: f32[128,128], index: 3, kind: input, shape index: {}]   ;;  %s821_s4 = inlined_call_operand.vmem [shape: f32[1,128], index: 4, kind: input, shape index: {}]   ;;  %s822_s5 = inlined_call_operand.hbm [shape: f32[16,128], index: 5, kind: output, shape index: {}]  }
   0x1   :  { %11 = vsyncpa [#allocation6], 0 }
   0x2   :  { %12 = vsyncpa [#allocation4], 0  ;;  %s708_s18 = smov [#allocation5]   ;;  %s709_s20 = smov [#allocation2]  }
   0x3   :  { %s46_s19 = sshll.u32 %s708_s18, 4  ;;  %s18_s21 = sshll.u32 %s709_s20, 4  ;;  %s47_s19 = int_to_ptr.vmem [resolvable:$true] %s46_s19  ;;  %s744_s21 = int_to_ptr.vmem [resolvable:$true] %s18_s21 }
   0x4   :  { %s614_s24 = scalar_lea.hbm %s818_s1, 2048 }
   0x5   :  { %p615_p0 = scmp.ne.s32.totalorder %s818_s1, %s614_s24  ;;  %p618_p1 = scmp.lt.u32.totalorder %s614_s24, %s818_s1 }
   0x7   :  { %p620_p2 = pnand %p618_p1, %p615_p0 }
   0x9   :  { %623 = shalt.err (!%p620_p2)
}
   0xa   :  { %s624_s29 = scalar_lea.vmem %s47_s19, 2048  ;;  %p629_p4 = scmp.lt.s32.totalorder %s47_s19, %s47_s19 }
   0xb   :  { %p625_p3 = scmp.ne.s32.totalorder %s47_s19, %s624_s29  ;;  %p630_p5 = scmp.lt.s32.totalorder %s624_s29, %s624_s29 }
   0xd   :  { %p631_p6 = por %p630_p5, %p629_p4 }
   0xf   :  { %p632_p7 = pnand %p631_p6, %p625_p3 }
  0x11   :  { %635 = shalt.err (!%p632_p7)
}
  0x12   :  { %s710_s30 = smov 128   ;;  %s711_s6 = smov 8  }
  0x13   :  { %52 = dma.hbm_to_vmem [thread:$0]  %s818_s1, 2048, %s47_s19, [#allocation6], %s710_s30, %s710_s30, %s711_s6  }
  0x14   :  { %s636_s11 = scalar_lea.hbm %s817_s0, 256 }
  0x15   :  { %p637_p8 = scmp.ne.s32.totalorder %s817_s0, %s636_s11  ;;  %p640_p9 = scmp.lt.u32.totalorder %s636_s11, %s817_s0 }
  0x17   :  { %p642_p10 = pnand %p640_p9, %p637_p8 }
  0x19   :  { %645 = shalt.err (!%p642_p10)
}
  0x1a   :  { %s646_s16 = scalar_lea.vmem %s744_s21, 256  ;;  %p651_p12 = scmp.lt.s32.totalorder %s744_s21, %s744_s21 }
  0x1b   :  { %p647_p11 = scmp.ne.s32.totalorder %s744_s21, %s646_s16  ;;  %p652_p13 = scmp.lt.s32.totalorder %s646_s16, %s646_s16 }
  0x1d   :  { %p653_p0 = por %p652_p13, %p651_p12 }
  0x1f   :  { %p654_p1 = pnand %p653_p0, %p647_p11 }
  0x21   :  { %657 = shalt.err (!%p654_p1)
}
  0x22   :  { %24 = dma.hbm_to_vmem [thread:$0]  %s817_s0, 256, %s744_s21, [#allocation3], %s710_s30, %s710_s30, %s711_s6  }
  0x23   :  { %s712_s18 = smov [#allocation7]   ;;  %s658_s23 = scalar_lea.hbm %s820_s3, 2048 }
  0x24   :  { %s104_s19 = sshll.u32 %s712_s18, 4  ;;  %p659_p2 = scmp.ne.s32.totalorder %s820_s3, %s658_s23  ;;  %s105_s19 = int_to_ptr.vmem [resolvable:$true] %s104_s19 }
  0x25   :  { %p662_p3 = scmp.lt.u32.totalorder %s658_s23, %s820_s3 }
  0x27   :  { %p664_p4 = pnand %p662_p3, %p659_p2 }
  0x29   :  { %667 = shalt.err (!%p664_p4)
}
  0x2a   :  { %s668_s28 = scalar_lea.vmem %s105_s19, 2048  ;;  %p673_p6 = scmp.lt.s32.totalorder %s105_s19, %s105_s19 }
  0x2b   :  { %p669_p5 = scmp.ne.s32.totalorder %s105_s19, %s668_s28  ;;  %p674_p7 = scmp.lt.s32.totalorder %s668_s28, %s668_s28 }
  0x2d   :  { %p675_p8 = por %p674_p7, %p673_p6 }
  0x2f   :  { %p676_p9 = pnand %p675_p8, %p669_p5 }
  0x31   :  { %679 = shalt.err (!%p676_p9)
}
  0x32   :  { %110 = dma.hbm_to_vmem [thread:$0]  %s820_s3, 2048, %s105_s19, [#allocation6], %s710_s30, %s710_s30, %s711_s6  }
  0x33   :  { %702 = dma.done.wait [#allocation3], 256  }
  0x34   :  { %703 = vsyncadd [#allocation3], 4294967040 }
  0x35   :  { %704 = dma.done.wait [#allocation6], 4096  }
  0x36   :  { %705 = vsyncadd [#allocation6], 4294963200  ;;  %v210_v0 = vld [vmem:[#allocation5] sm:$0xff]  ;;  %v211_v1 = vld [vmem:[#allocation5 + $0x8] sm:$0xff]  ;;  %s713_s9 = smov [#allocation8]  }
  0x37   :  { %v212_v2 = vld [vmem:[#allocation5 + $0x10] sm:$0xff]  ;;  %v544_v3 = vpack.c.bf16 %v211_v1, %v210_v0  ;;  %v213_v4 = vld [vmem:[#allocation5 + $0x18] sm:$0xff]  ;;  %v214_v6 = vld [vmem:[#allocation5 + $0x20] sm:$0xff]  ;;  %s412_s10 = sshll.u32 %s713_s9, 4  ;;  %s413_s10 = int_to_ptr.vmem [resolvable:$true] %s412_s10 }
  0x38   :  { %v548_v5 = vpack.c.bf16 %v213_v4, %v212_v2  ;;  %v215_v7 = vld [vmem:[#allocation5 + $0x28] sm:$0xff]  ;;  %v208_v8 = vld [vmem:[#allocation2] sm:$0xff]  ;;  %v312_v9 = vld [vmem:[#allocation7] sm:$0xff]  ;;  %p685_p11 = scmp.lt.s32.totalorder %s413_s10, %s413_s10 }
  0x39   :  { %545 = vmatprep.subr.bf16.mxu0 %v544_v3  ;;  %506 = vmatprep.mubr.f32.mxu0 %v208_v8  ;;  %v313_v10 = vld [vmem:[#allocation7 + $0x8] sm:$0xff]  ;;  %v314_v11 = vld [vmem:[#allocation7 + $0x10] sm:$0xff]  ;;  %v315_v13 = vld [vmem:[#allocation7 + $0x18] sm:$0xff]  ;;  %v552_v15 = vpack.c.bf16 %v215_v7, %v214_v6 }
  0x3a   :  { %547 = vmatpush3.bf16.xpose.msra.mxu0 %v544_v3  ;;  %v576_v12 = vpack.c.bf16 %v313_v10, %v312_v9  ;;  %v580_v14 = vpack.c.bf16 %v315_v13, %v314_v11  ;;  %v316_v16 = vld [vmem:[#allocation7 + $0x20] sm:$0xff]  ;;  %v317_v17 = vld [vmem:[#allocation7 + $0x28] sm:$0xff]  ;;  %v216_v18 = vld [vmem:[#allocation5 + $0x30] sm:$0xff] }
  0x3b   :  { %549 = vmatprep.subr.bf16.mxu0 %v548_v5  ;;  %v217_v19 = vld [vmem:[#allocation5 + $0x38] sm:$0xff]  ;;  %v584_v20 = vpack.c.bf16 %v317_v17, %v316_v16  ;;  %v318_v22 = vld [vmem:[#allocation7 + $0x30] sm:$0xff]  ;;  %v218_v24 = vld [vmem:[#allocation5 + $0x40] sm:$0xff] }
  0x3c   :  { %577 = vmatprep.subr.bf16.mxu1 %v576_v12  ;;  %v556_v21 = vpack.c.bf16 %v217_v19, %v216_v18  ;;  %v319_v23 = vld [vmem:[#allocation7 + $0x38] sm:$0xff]  ;;  %v219_v25 = vld [vmem:[#allocation5 + $0x48] sm:$0xff]  ;;  %v320_v28 = vld [vmem:[#allocation7 + $0x40] sm:$0xff] }
  0x3d   :  { %579 = vmatpush3.bf16.xpose.msra.mxu1 %v576_v12  ;;  %v588_v26 = vpack.c.bf16 %v319_v23, %v318_v22  ;;  %v560_v27 = vpack.c.bf16 %v219_v25, %v218_v24  ;;  %v321_v29 = vld [vmem:[#allocation7 + $0x48] sm:$0xff]  ;;  %v220_v30 = vld [vmem:[#allocation5 + $0x50] sm:$0xff]  ;;  %v221_v31 = vld [vmem:[#allocation5 + $0x58] sm:$0xff] }
  0x3e   :  { %581 = vmatprep.subr.bf16.mxu1 %v580_v14  ;;  %v592_v32 = vpack.c.bf16 %v321_v29, %v320_v28  ;;  %v564_v33 = vpack.c.bf16 %v221_v31, %v220_v30  ;;  %v322_v34 = vld [vmem:[#allocation7 + $0x50] sm:$0xff]  ;;  %v323_v35 = vld [vmem:[#allocation7 + $0x58] sm:$0xff]  ;;  %v222_v36 = vld [vmem:[#allocation5 + $0x60] sm:$0xff] }
  0x3f   :  { %v223_v37 = vld [vmem:[#allocation5 + $0x68] sm:$0xff]  ;;  %v596_v38 = vpack.c.bf16 %v323_v35, %v322_v34  ;;  %v324_v40 = vld [vmem:[#allocation7 + $0x60] sm:$0xff]  ;;  %v224_v42 = vld [vmem:[#allocation5 + $0x70] sm:$0xff] }
  0x40   :  { %v568_v39 = vpack.c.bf16 %v223_v37, %v222_v36  ;;  %v325_v41 = vld [vmem:[#allocation7 + $0x68] sm:$0xff]  ;;  %v225_v43 = vld [vmem:[#allocation5 + $0x78] sm:$0xff]  ;;  %v326_v46 = vld [vmem:[#allocation7 + $0x70] sm:$0xff] }
  0x41   :  { %v600_v44 = vpack.c.bf16 %v325_v41, %v324_v40  ;;  %v572_v45 = vpack.c.bf16 %v225_v43, %v224_v42  ;;  %v327_v47 = vld [vmem:[#allocation7 + $0x78] sm:$0xff]  ;;  %v437_v50 = vld [vmem:[%s819_s2] ss:$0 sm:$0xff]  ;;  %s680_s2 = scalar_lea.vmem %s413_s10, 256 }
  0x42   :  { %551 = vmatpush3.bf16.xpose.msra.mxu0 %v548_v5  ;;  %v604_v48 = vpack.c.bf16 %v327_v47, %v326_v46  ;;  %v209_v49 = vld [vmem:[#allocation2 + $0x8] sm:$0xff]  ;;  %v436_v57 = vld [vmem:[%s821_s4] ss:$0 sm:$0xff]  ;;  %p681_p10 = scmp.ne.s32.totalorder %s413_s10, %s680_s2  ;;  %p686_p12 = scmp.lt.s32.totalorder %s680_s2, %s680_s2 }
  0x43   :  { %553 = vmatprep.subr.bf16.mxu0 %v552_v15 }
  0x44   :  { %p687_p13 = por %p686_p12, %p685_p11 }
  0x45   :  { %583 = vmatpush3.bf16.xpose.msra.mxu1 %v580_v14 }
  0x46   :  { %585 = vmatprep.subr.bf16.mxu1 %v584_v20  ;;  %p688_p0 = pnand %p687_p13, %p681_p10 }
  0x4a   :  { %555 = vmatpush3.bf16.xpose.msra.mxu0 %v552_v15 }
  0x4b   :  { %557 = vmatprep.subr.bf16.mxu0 %v556_v21 }
  0x4d   :  { %587 = vmatpush3.bf16.xpose.msra.mxu1 %v584_v20 }
  0x4e   :  { %589 = vmatprep.subr.bf16.mxu1 %v588_v26 }
  0x52   :  { %559 = vmatpush3.bf16.xpose.msra.mxu0 %v556_v21 }
  0x53   :  { %561 = vmatprep.subr.bf16.mxu0 %v560_v27 }
  0x55   :  { %591 = vmatpush3.bf16.xpose.msra.mxu1 %v588_v26 }
  0x56   :  { %593 = vmatprep.subr.bf16.mxu1 %v592_v32 }
  0x5a   :  { %563 = vmatpush3.bf16.xpose.msra.mxu0 %v560_v27 }
  0x5b   :  { %565 = vmatprep.subr.bf16.mxu0 %v564_v33 }
  0x5d   :  { %595 = vmatpush3.bf16.xpose.msra.mxu1 %v592_v32 }
  0x5e   :  { %597 = vmatprep.subr.bf16.mxu1 %v596_v38 }
  0x62   :  { %567 = vmatpush3.bf16.xpose.msra.mxu0 %v564_v33 }
  0x63   :  { %569 = vmatprep.subr.bf16.mxu0 %v568_v39 }
  0x65   :  { %599 = vmatpush3.bf16.xpose.msra.mxu1 %v596_v38 }
  0x66   :  { %601 = vmatprep.subr.bf16.mxu1 %v600_v44 }
  0x6a   :  { %571 = vmatpush3.bf16.xpose.msra.mxu0 %v568_v39 }
  0x6b   :  { %573 = vmatprep.subr.bf16.mxu0 %v572_v45 }
  0x6d   :  { %603 = vmatpush3.bf16.xpose.msra.mxu1 %v600_v44 }
  0x6e   :  { %605 = vmatprep.subr.bf16.mxu1 %v604_v48 }
  0x72   :  { %575 = vmatpush3.bf16.xpose.msra.mxu0 %v572_v45 }
  0x75   :  { %607 = vmatpush3.bf16.xpose.msra.mxu1 %v604_v48 }
  0x79   :  { %507 = vmatmul.mubr.f32.vlgmr.msra.gmra.mrb[0].mxu0 %v209_v49 }
 0x14c   :  { %v508_v51 = vpop.f32.mrb[0].mxu0 }
 0x14d   :  { %v305_v52 = vadd.f32 %v508_v51, %v437_v50  ;;  %v299_v53 = vpop.f32.mrb[1].mxu0 }
 0x14e   :  { %v300_v54 = vadd.f32 %v437_v50, %v299_v53 }
 0x14f   :  { %v309_v56 = vmax.f32 %v305_v52, 0.0 }
 0x150   :  { %v308_v55 = vmax.f32 %v300_v54, 0.0 }
 0x152   :  { %541 = vmatprep.mubr.f32.mxu1 %v308_v55 }
 0x153   :  { %542 = vmatmul.mubr.f32.vlgmr.msra.gmra.mrb[0].mxu1 %v309_v56 }
 0x226   :  { %v543_v58 = vpop.f32.mrb[0].mxu1 }
 0x227   :  { %v404_v59 = vadd.f32 %v543_v58, %v436_v57  ;;  %v394_v60 = vpop.f32.mrb[1].mxu1 }
 0x228   :  { %v403_v61 = vadd.f32 %v436_v57, %v394_v60 }
 0x229   :  { %406 = vst [vmem:[#allocation8 + $0x8] sm:$0xff] %v404_v59 }
 0x22a   :  { %405 = vst [vmem:[#allocation8] sm:$0xff] %v403_v61 }
 0x22b   :  { %691 = shalt.err (!%p688_p0)
}
 0x22c   :  { %s692_s4 = scalar_lea.hbm %s822_s5, 256 }
 0x22d   :  { %p693_p1 = scmp.ne.s32.totalorder %s822_s5, %s692_s4  ;;  %p696_p2 = scmp.lt.u32.totalorder %s692_s4, %s822_s5 }
 0x22f   :  { %p698_p3 = pnand %p696_p2, %p693_p1 }
 0x231   :  { %701 = shalt.err (!%p698_p3)
}
 0x232   :  { %418 = dma.vmem_to_hbm [thread:$0]  %s413_s10, 256, %s822_s5, [#allocation4], %s710_s30, %s710_s30, %s711_s6  }
 0x233   :  { %706 = dma.done.wait [#allocation4], 256  }
 0x234   :  { %707 = vsyncadd [#allocation4], 4294967040 }
 0x235   :  { %422 = vsyncpa [#allocation3], 1 }
 0x236   :  { %423 = vsyncpa [#allocation6], 1 }
 0x237   :  { %424 = vsyncpa [#allocation4], 1 }

</bundles_post_ra>
